<compile_context>
chip_gen: v7x
topology: tpu7x:2x2x1
jax: 0.10.0
libtpu: 0.0.40
codegen_flags: <defaults>
</compile_context>

<pallas_src>
import jax
import jax.numpy as jnp
from jax import lax
from jax.experimental import pallas as pl
from jax.experimental.pallas import tpu as pltpu
import numpy as np

BN_EPS = 1e-5
_PAD_TOP = 16   # tile-aligned data start row in the VMEM pad scratch (f32 (8,128) & bf16 (16,128))
_PAD_BOT = 8    # >= 1 zero row below the data


def _vmem_limit_bytes():
    """Generation-dependent scoped-VMEM budget (v7x: ~48 MiB, v5e/v6e: ~96-112 MiB)."""
    try:
        phys = int(pltpu.get_tpu_info().vmem_capacity_bytes)
    except Exception:
        phys = 128 * 1024 * 1024
    return int(min(0.75 * phys, 112 * 1024 * 1024))


# ---------------------------------------------------------------------------
# Weight builders (wrapper side, plain XLA)
# ---------------------------------------------------------------------------
def _banded_conv3x3_weight(w_scaled, W, dtype):
    """w_scaled: (Cout, Cin, 3, 3) torch layout with BN scale folded in.

    Returns BW of shape (3, W*Cin, W*Cout) such that, for the W-folded padded rows
    xrow[h+dy-1] (zeros outside [0,H)):
        out[h, w*Cout + o] = sum_dy  xrow[h+dy-1] @ BW[dy]
    The kx taps and the zero padding in W are encoded in the band structure:
        BW[dy][w'*Cin + c, w*Cout + o] = w_scaled[o, c, dy, w'-w+1]  if |w'-w| <= 1.
    """
    mats = []
    for dy in range(3):
        m = jnp.zeros((W * w_scaled.shape[1], W * w_scaled.shape[0]), jnp.float32)
        for kx in range(3):
            blk = jnp.transpose(w_scaled[:, :, dy, kx])            # (Cin, Cout)
            m = m + jnp.kron(jnp.eye(W, k=1 - kx, dtype=jnp.float32), blk)
        mats.append(m)
    return jnp.stack(mats).astype(dtype)


def _blockdiag_upconv_weight(w_up, Win, dtype):
    """w_up: (Cin, Cout, 2, 2) torch ConvTranspose2d layout.

    Returns BU of shape (Win*Cin, 2*2*Win*Cout) with output-column order
    (di, w, dj, o), so that  y = x2d @ BU  directly yields the upsampled image in
    a layout whose flat order equals (2*Hin, 2*Win, Cout)."""
    Cin, Cout = w_up.shape[0], w_up.shape[1]
    wt = jnp.transpose(w_up, (2, 0, 3, 1)).reshape(2, Cin, 2 * Cout)   # [di, c, dj*Cout+o]
    eye = jnp.eye(Win, dtype=jnp.float32)
    bu = jnp.concatenate([jnp.kron(eye, wt[0]), jnp.kron(eye, wt[1])], axis=1)
    return bu.astype(dtype)


# ---------------------------------------------------------------------------
# ConvTranspose2d(k=2, s=2) kernel: one matmul, one dense store per grid step.
# ---------------------------------------------------------------------------
def _upconv_kernel(x_ref, w_ref, b_ref, o_ref):
    y = jnp.dot(x_ref[0], w_ref[...], preferred_element_type=jnp.float32)
    o_ref[0] = (y + b_ref[...]).astype(o_ref.dtype)


def conv_transpose2x2_s2(x2d, w, b, Win, compute_dtype):
    """x2d: (N, Hin, Win*Cin) W-folded input.  w: (Cin, Cout, 2, 2), b: (Cout,).
    Returns the upsampled activation in W-folded form (N, 2*Hin, 2*Win*Cout)."""
    N, Hin, _ = x2d.shape
    Cin, Cout = w.shape[0], w.shape[1]
    out_cols = 4 * Win * Cout

    bu = _blockdiag_upconv_weight(w, Win, compute_dtype)
    bias_wide = jnp.tile(b, 4 * Win).reshape(1, out_cols).astype(jnp.float32)
    x_c = x2d.astype(compute_dtype)

    itemsize = jnp.dtype(compute_dtype).itemsize
    flops = 2 * N * Hin * (Win * Cin) * out_cols
    bytes_accessed = (int(x_c.size) + int(bu.size) + N * Hin * out_cols) * itemsize

    out = pl.pallas_call(
        _upconv_kernel,
        out_shape=jax.ShapeDtypeStruct((N, Hin, out_cols), compute_dtype),
        grid=(N,),
        in_specs=[pl.BlockSpec((1, Hin, Win * Cin), lambda n: (n, 0, 0)),
                  pl.BlockSpec((Win * Cin, out_cols), lambda n: (0, 0)),
                  pl.BlockSpec((1, out_cols), lambda n: (0, 0))],
        out_specs=pl.BlockSpec((1, Hin, out_cols), lambda n: (n, 0, 0)),
        compiler_params=pltpu.CompilerParams(
            dimension_semantics=("parallel",),
            vmem_limit_bytes=_vmem_limit_bytes()),
        cost_estimate=pl.CostEstimate(flops=flops, transcendentals=0,
                                      bytes_accessed=bytes_accessed),
    )(x_c, bu, bias_wide)
    # (N, Hin, 2*2*Win*Cout) -> (N, 2*Hin, 2*Win*Cout): identical flat order (free).
    return out.reshape(N, 2 * Hin, 2 * Win * Cout)


# ---------------------------------------------------------------------------
# Fused (virtual concat) + Conv2d(3x3, pad=1) + BN(eval) + ReLU kernel.
# 3 banded dots per source, dense (H, W*Cout) f32 accumulator, dense store.
# ---------------------------------------------------------------------------
def _make_conv_kernel(n_src, H, wcs, wcout, dtype):
    rows = _PAD_TOP + H + _PAD_BOT

    def kernel(*refs):
        srcs = refs[:n_src]
        bws = refs[n_src:2 * n_src]
        shift = refs[2 * n_src]
        out = refs[2 * n_src + 1]
        pads = refs[2 * n_src + 2:]

        acc = jnp.zeros((H, wcout), jnp.float32)
        for s in range(n_src):
            # Zero-padded row slab in VMEM (no HBM jnp.pad); data at a tile-aligned
            # row offset, W zero-padding lives in the weight band structure.
            pads[s][...] = jnp.zeros((rows, wcs[s]), dtype)
            pads[s][_PAD_TOP:_PAD_TOP + H, :] = srcs[s][0]
            for dy in range(3):
                r0 = _PAD_TOP - 1 + dy
                acc = acc + jnp.dot(pads[s][r0:r0 + H, :], bws[s][dy],
                                    preferred_element_type=jnp.float32)

        # BN scale folded into the weights; per-channel shift + ReLU in f32.
        out[0] = jnp.maximum(acc + shift[...], 0.0).astype(out.dtype)

    return kernel


def conv3x3_bn_relu(sources_2d, weights, gamma, beta, mean, var, W, compute_dtype):
    """Conv2d(3x3, pad=1, bias=False) + BatchNorm(eval) + ReLU with the channel
    concat of `sources_2d` fused into the kernel (each source gets its own banded
    weight slice, all accumulate into one dense f32 accumulator).

    sources_2d: list of W-folded (N, H, W*C_s) tensors (same N, H, W).
    weights:    list of torch-layout (Cout, C_s, 3, 3) slices matching sources."""
    N, H, _ = sources_2d[0].shape
    Cout = weights[0].shape[0]
    n_src = len(sources_2d)
    wcout = W * Cout

    scale = gamma / jnp.sqrt(var + BN_EPS)                       # folded into weights
    shift_wide = jnp.tile(beta - mean * scale, W).reshape(1, wcout).astype(jnp.float32)

    srcs = [s.astype(compute_dtype) for s in sources_2d]
    bws = [_banded_conv3x3_weight(w * scale[:, None, None, None], W, compute_dtype)
           for w in weights]
    wcs = [int(s.shape[2]) for s in srcs]

    itemsize = jnp.dtype(compute_dtype).itemsize
    flops = 2 * N * 3 * H * sum(wc * wcout for wc in wcs)
    bytes_accessed = (sum(int(s.size) for s in srcs) + sum(int(b_.size) for b_ in bws)
                      + N * H * wcout) * itemsize

    in_specs = ([pl.BlockSpec((1, H, wc), lambda n: (n, 0, 0)) for wc in wcs]
                + [pl.BlockSpec((3, wc, wcout), lambda n: (0, 0, 0)) for wc in wcs]
                + [pl.BlockSpec((1, wcout), lambda n: (0, 0))])
    scratch_shapes = [pltpu.VMEM((_PAD_TOP + H + _PAD_BOT, wc), compute_dtype)
                      for wc in wcs]

    out = pl.pallas_call(
        _make_conv_kernel(n_src, H, wcs, wcout, compute_dtype),
        out_shape=jax.ShapeDtypeStruct((N, H, wcout), compute_dtype),
        grid=(N,),
        in_specs=in_specs,
        out_specs=pl.BlockSpec((1, H, wcout), lambda n: (n, 0, 0)),
        scratch_shapes=scratch_shapes,
        compiler_params=pltpu.CompilerParams(
            dimension_semantics=("parallel",),
            vmem_limit_bytes=_vmem_limit_bytes()),
        cost_estimate=pl.CostEstimate(flops=flops, transcendentals=0,
                                      bytes_accessed=bytes_accessed),
    )(*srcs, *bws, shift_wide)
    return out


# ---------------------------------------------------------------------------
# Forward pass (NCHW in/out, like the PyTorch module)
# ---------------------------------------------------------------------------
def concat_upsample_forward(params, x_nchw, skip_nchw, compute_dtype=jnp.float32):
    N, Cin, Hin, Win = x_nchw.shape
    Cskip = skip_nchw.shape[1]
    Cout = params["up_w"].shape[1]
    H2, W2 = 2 * Hin, 2 * Win

    # NCHW -> W-folded NHWC (N, H, W*C): width & channels share the lane dim.
    x2d = jnp.transpose(x_nchw, (0, 2, 3, 1)).reshape(N, Hin, Win * Cin)
    skip2d = jnp.transpose(skip_nchw, (0, 2, 3, 1)).reshape(N, H2, W2 * Cskip)

    up2d = conv_transpose2x2_s2(x2d, params["up_w"], params["up_b"], Win, compute_dtype)

    # torch.cat([up, skip], dim=1) fused: split conv1's weight along input channels.
    w1_up = params["conv1_w"][:, :Cout]
    w1_sk = params["conv1_w"][:, Cout:]
    h2d = conv3x3_bn_relu([up2d, skip2d], [w1_up, w1_sk],
                          params["bn1_g"], params["bn1_b"],
                          params["bn1_m"], params["bn1_v"], W2, compute_dtype)
    h2d = conv3x3_bn_relu([h2d], [params["conv2_w"]],
                          params["bn2_g"], params["bn2_b"],
                          params["bn2_m"], params["bn2_v"], W2, compute_dtype)

    out_nhwc = h2d.reshape(N, H2, W2, Cout)          # free reshape
    return jnp.transpose(out_nhwc, (0, 3, 1, 2))


# ---------------------------------------------------------------------------
# Pure-JAX reference (NCHW, lax conv) for verification
# ---------------------------------------------------------------------------
def _ref_forward(params, x, skip):
    N, Cin, H, W = x.shape
    Cout = params["up_w"].shape[1]
    t = jnp.einsum("nchw,codk->nohdwk", x, params["up_w"])
    up = t.reshape(N, Cout, 2 * H, 2 * W) + params["up_b"][None, :, None, None]
    cat = jnp.concatenate([up, skip], axis=1)

    def conv_bn_relu(z, w, g, b, m, v):
        y = lax.conv_general_dilated(z, w, (1, 1), ((1, 1), (1, 1)),
                                     dimension_numbers=("NCHW", "OIHW", "NCHW"))
        s = g / jnp.sqrt(v + BN_EPS)
        y = y * s[None, :, None, None] + (b - m * s)[None, :, None, None]
        return jnp.maximum(y, 0.0)

    h = conv_bn_relu(cat, params["conv1_w"], params["bn1_g"], params["bn1_b"],
                     params["bn1_m"], params["bn1_v"])
    h = conv_bn_relu(h, params["conv2_w"], params["bn2_g"], params["bn2_b"],
                     params["bn2_m"], params["bn2_v"])
    return h


# ---------------------------------------------------------------------------
def init_params(key, in_channels, out_channels):
    ks = jax.random.split(key, 12)
    return {
        # nn.ConvTranspose2d(in, out, k=2, s=2): weight (in, out, 2, 2), bias (out,)
        "up_w": 0.1 * jax.random.normal(ks[0], (in_channels, out_channels, 2, 2), jnp.float32),
        "up_b": 0.1 * jax.random.normal(ks[1], (out_channels,), jnp.float32),
        # DoubleConvolution(in, out): conv1 (out, in, 3, 3), conv2 (out, out, 3, 3)
        "conv1_w": 0.1 * jax.random.normal(ks[2], (out_channels, in_channels, 3, 3), jnp.float32),
        "conv2_w": 0.1 * jax.random.normal(ks[3], (out_channels, out_channels, 3, 3), jnp.float32),
        # BatchNorm2d params / running stats (eval-mode semantics)
        "bn1_g": 1.0 + 0.1 * jax.random.normal(ks[4], (out_channels,), jnp.float32),
        "bn1_b": 0.1 * jax.random.normal(ks[5], (out_channels,), jnp.float32),
        "bn1_m": 0.1 * jax.random.normal(ks[6], (out_channels,), jnp.float32),
        "bn1_v": 1.0 + 0.2 * jax.random.uniform(ks[7], (out_channels,), jnp.float32),
        "bn2_g": 1.0 + 0.1 * jax.random.normal(ks[8], (out_channels,), jnp.float32),
        "bn2_b": 0.1 * jax.random.normal(ks[9], (out_channels,), jnp.float32),
        "bn2_m": 0.1 * jax.random.normal(ks[10], (out_channels,), jnp.float32),
        "bn2_v": 1.0 + 0.2 * jax.random.uniform(ks[11], (out_channels,), jnp.float32),
    }


if __name__ == "__main__":
    key = jax.random.PRNGKey(0)
    in_channels, out_channels = 16, 8
    N, Hin, Win = 2, 16, 16

    k1, k2, k3 = jax.random.split(key, 3)
    params = init_params(k1, in_channels, out_channels)
    # x: low-res features (NCHW), skip: high-res skip connection (NCHW).
    x = jax.random.normal(k2, (N, in_channels, Hin, Win), jnp.float32)
    skip = jax.random.normal(
        k3, (N, in_channels - out_channels, 2 * Hin, 2 * Win), jnp.float32)

    ref = jax.block_until_ready(_ref_forward(params, x, skip))

    # f32 path: tight numerical check against the lax reference.
    out_f32 = jax.block_until_ready(
        concat_upsample_forward(params, x, skip, compute_dtype=jnp.float32))
    assert out_f32.shape == (N, out_channels, 2 * Hin, 2 * Win), out_f32.shape
    np.testing.assert_allclose(np.asarray(out_f32), np.asarray(ref), rtol=1e-4, atol=1e-4)

    # bf16 MXU-operand path (valid on v5e/v6e/v7x, f32 accumulation): loose check.
    out_bf16 = jax.block_until_ready(
        concat_upsample_forward(params, x, skip, compute_dtype=jnp.bfloat16))
    np.testing.assert_allclose(np.asarray(out_bf16, dtype=np.float32), np.asarray(ref),
                               rtol=2e-1, atol=2e-1)

    print("KERNEL_OK")
</pallas_src>

<mosaic_0001>
module attributes {stable_mosaic.version = 11 : i64} {
  func.func @_upconv_kernel(%arg0: i32, %arg1: memref<1x16x256xf32, #tpu.memory_space<vmem>>, %arg2: memref<256x512xf32, #tpu.memory_space<vmem>>, %arg3: memref<1x512xf32, #tpu.memory_space<vmem>>, %arg4: memref<1x16x512xf32, #tpu.memory_space<vmem>>) attributes {dimension_semantics = [#tpu.dimension_semantics<parallel>], iteration_bounds = array<i64: 2>, scalar_prefetch = 0 : i64, scratch_operands = 0 : i64, tpu.core_type = #tpu.core_type<tc>, window_params = [{transform_indices = @transform_0, window_bounds = array<i64: 1, 16, 256>}, {pipeline_mode = #tpu.pipeline_mode<synchronous>, transform_indices = @transform_1, window_bounds = array<i64: 256, 512>}, {pipeline_mode = #tpu.pipeline_mode<synchronous>, transform_indices = @transform_2, window_bounds = array<i64: 1, 512>}, {transform_indices = @transform_3, window_bounds = array<i64: 1, 16, 512>}]} {
    %c0 = arith.constant 0 : index
    %c0_0 = arith.constant 0 : index
    %c0_1 = arith.constant 0 : index
    %0 = vector.load %arg1[%c0, %c0_0, %c0_1] : memref<1x16x256xf32, #tpu.memory_space<vmem>>, vector<1x16x256xf32>
    %1 = vector.shape_cast %0 : vector<1x16x256xf32> to vector<16x256xf32>
    %c0_2 = arith.constant 0 : index
    %c0_3 = arith.constant 0 : index
    %2 = vector.load %arg2[%c0_2, %c0_3] : memref<256x512xf32, #tpu.memory_space<vmem>>, vector<256x512xf32>
    %cst = arith.constant dense<0.000000e+00> : vector<16x512xf32>
    %3 = tpu.matmul %1, %2, %cst {dimension_numbers = #tpu.dot_dimension_numbers<[1], [0], [0], [1], [0, 0, 1, 1], [], []>} : vector<16x256xf32>, vector<256x512xf32>, vector<16x512xf32> -> vector<16x512xf32>
    %c0_4 = arith.constant 0 : index
    %c0_5 = arith.constant 0 : index
    %4 = vector.load %arg3[%c0_4, %c0_5] : memref<1x512xf32, #tpu.memory_space<vmem>>, vector<1x512xf32>
    %5 = vector.broadcast %4 : vector<1x512xf32> to vector<16x512xf32>
    %6 = arith.addf %3, %5 : vector<16x512xf32>
    %c0_6 = arith.constant 0 : index
    %c0_7 = arith.constant 0 : index
    %c0_8 = arith.constant 0 : index
    %7 = vector.load %arg4[%c0_6, %c0_7, %c0_8] : memref<1x16x512xf32, #tpu.memory_space<vmem>>, vector<1x16x512xf32>
    %8 = vector.shape_cast %7 : vector<1x16x512xf32> to vector<16x512xf32>
    %9 = vector.shape_cast %6 : vector<16x512xf32> to vector<1x16x512xf32>
    tpu.vector_store %arg4[%c0_6, %c0_7, %c0_8], %9 {strides = array<i32>} : memref<1x16x512xf32, #tpu.memory_space<vmem>>, vector<1x16x512xf32>,
    return
  }
  func.func @transform_0(%arg0: i32) -> (i32, i32, i32) {
    %c0_i32 = arith.constant 0 : i32
    %c0_i32_0 = arith.constant 0 : i32
    %c0_i32_1 = arith.constant 0 : i32
    return %arg0, %c0_i32, %c0_i32_0 : i32, i32, i32
  }
  func.func @transform_1(%arg0: i32) -> (i32, i32) {
    %c0_i32 = arith.constant 0 : i32
    %c0_i32_0 = arith.constant 0 : i32
    %c0_i32_1 = arith.constant 0 : i32
    return %c0_i32, %c0_i32_0 : i32, i32
  }
  func.func @transform_2(%arg0: i32) -> (i32, i32) {
    %c0_i32 = arith.constant 0 : i32
    %c0_i32_0 = arith.constant 0 : i32
    %c0_i32_1 = arith.constant 0 : i32
    return %c0_i32, %c0_i32_0 : i32, i32
  }
  func.func @transform_3(%arg0: i32) -> (i32, i32, i32) {
    %c0_i32 = arith.constant 0 : i32
    %c0_i32_0 = arith.constant 0 : i32
    %c0_i32_1 = arith.constant 0 : i32
    return %arg0, %c0_i32, %c0_i32_0 : i32, i32, i32
  }
}

</mosaic_0001>

<bundles_post_ra>
// kernel: tpu_custom_call.1
= control target key start
LH: loop header
LB: loop body
LE: loop exit
PB: predicated region body
PF: predicated region fallthrough
CT: control target
= control target key end

     0   :  { %8 = vsyncpa [#allocation3], 0  ;;  %s1288_s0 = inlined_call_operand.hbm [shape: f32[2,16,256], index: 0, kind: input, shape index: {}]   ;;  %s1289_s1 = inlined_call_operand.hbm [shape: f32[256,512], index: 1, kind: input, shape index: {}]   ;;  %s1290_s2 = inlined_call_operand.hbm [shape: f32[1,512], index: 2, kind: input, shape index: {}]   ;;  %s1291_s3 = inlined_call_operand.hbm [shape: f32[2,16,512], index: 3, kind: output, shape index: {}]  }
   0x1   :  { %10 = vsyncpa [#allocation3 + $0x1], 0 }
   0x2   :  { %11 = vsyncpa [#allocation6], 0 }
   0x3   :  { %12 = vsyncpa [#allocation4], 0 }
   0x4   :  { %14 = vsyncpa [#allocation4 + $0x1], 0  ;;  %s1047_s12 = smov 0   ;;  %s1049_s13 = smov 0  }
   0x5   :  { %s1051_s14 = smov 0   ;;  %s1053_s15 = smov 0  }
   0x6 LB: > { %s1068_s16 = sadd.s32 4294967295, %s1015_s15   ;;  %s638_s17 = sadd.s32 4294967294, %s1015_s15   ;;  %s1015_s15 = sphi %s1053_s15, %s1311_s15   ;;  %s1011_s14 = sphi %s1051_s14, %s1310_s14   ;;  %s1007_s13 = sphi %s1049_s13, %s1309_s13   ;;  %s1003_s12 = sphi %s1047_s12, %s1308_s12  }
   0x7   : > { %p40_p0 = scmp.ne.s32.totalorder %s1007_s13, %s1003_s12  ;;  %p1292_p1 = scmp.eq.s32.totalorder %s1068_s16, 0 }
   0x8   : > { %p112_p3 = scmp.eq.s32.totalorder %s638_s17, 1  ;;  %p639_p5 = scmp.ge.s32.totalorder %s1015_s15, 1 }
   0x9   : > { %p1077_p4 = por %p1292_p1, %p40_p0  ;;  %p119_p7 = scmp.lt.s32.totalorder %s1015_s15, 3 }
   0xa   : > { %p1082_p6 = por %p112_p3, %p40_p0  ;;  %s1017_s21 = smov [#allocation5]  }
   0xb   : > { %s1295_s18 = scalar_select %p1077_p4, 1, 0 }
   0xc   : > { %s1296_s19 = scalar_select %p1082_p6, 1, 0 }
   0xd   : > { %p1087_p8 = pnand %p639_p5, %p119_p7  ;;  %s131_s22 = sshll.u32 %s1017_s21, 4  ;;  %s1091_s22 = int_to_ptr.vmem [resolvable:$true] %s131_s22 }
   0xe   : > { %s1018_s24 = smov [#allocation7]   ;;  %s859_s28 = scalar_lea.hbm %s1289_s1, 16384 }
   0xf   : > { %p798_p9 = pneg %p1087_p8  ;;  %s145_s25 = sshll.u32 %s1018_s24, 4  ;;  %s1102_s25 = int_to_ptr.vmem [resolvable:$true] %s145_s25 }
  0x10   : > { %p860_p12 = scmp.ne.s32.totalorder %s1289_s1, %s859_s28  ;;  %p866_p5 = scmp.lt.u32.totalorder %s859_s28, %s1289_s1 }
  0x11   : > { %p1098_p11 = pnand %p798_p9, %p1292_p1 }
  0x13   : > { %p861_p13 = pneg %p1098_p11 }
  0x15   : > { %p862_p0 = pnand %p861_p13, %p860_p12 }
  0x17   : > { %p863_p3 = pneg %p862_p0 }
  0x19   : > { %p868_p7 = pnand %p866_p5, %p863_p3 }
  0x1b   : > { %871 = shalt.err (!%p868_p7)
}
  0x1c   : > { %s872_s6 = scalar_lea.vmem %s1091_s22, 16384  ;;  %p880_p2 = scmp.lt.s32.totalorder %s1091_s22, %s1091_s22 }
  0x1d   : > { %p873_p9 = scmp.ne.s32.totalorder %s1091_s22, %s872_s6  ;;  %p881_p12 = scmp.lt.s32.totalorder %s872_s6, %s872_s6 }
  0x1f   : > { %p875_p10 = pnand %p873_p9, %p861_p13  ;;  %p882_p0 = por %p881_p12, %p880_p2 }
  0x21   : > { %p876_p1 = pneg %p875_p10 }
  0x23   : > { %p883_p6 = pnand %p882_p0, %p876_p1 }
  0x25   : > { %886 = shalt.err (!%p883_p6)
}
  0x26   : > { %s1019_s7 = smov 512   ;;  %s1020_s8 = smov 32  }
  0x27   : > { %801 = dma.hbm_to_vmem [thread:$0]  (!%p1098_p11), %s1289_s1, 16384, %s1091_s22, [#allocation6], %s1019_s7, %s1019_s7, %s1020_s8  }
  0x28   : > { %s887_s21 = scalar_lea.hbm %s1290_s2, 64 }
  0x29   : > { %p888_p2 = scmp.ne.s32.totalorder %s1290_s2, %s887_s21  ;;  %p894_p10 = scmp.lt.u32.totalorder %s887_s21, %s1290_s2 }
  0x2b   : > { %p890_p1 = pnand %p888_p2, %p861_p13 }
  0x2d   : > { %p891_p6 = pneg %p890_p1 }
  0x2f   : > { %p896_p3 = pnand %p894_p10, %p891_p6 }
  0x31   : > { %899 = shalt.err (!%p896_p3)
}
  0x32   : > { %s900_s22 = scalar_lea.vmem %s1102_s25, 64  ;;  %p908_p12 = scmp.lt.s32.totalorder %s1102_s25, %s1102_s25 }
  0x33   : > { %p901_p5 = scmp.ne.s32.totalorder %s1102_s25, %s900_s22  ;;  %p909_p0 = scmp.lt.s32.totalorder %s900_s22, %s900_s22 }
  0x35   : > { %p903_p7 = pnand %p901_p5, %p861_p13  ;;  %p910_p2 = por %p909_p0, %p908_p12 }
  0x37   : > { %p904_p9 = pneg %p903_p7 }
  0x39   : > { %p911_p1 = pnand %p910_p2, %p904_p9 }
  0x3b   : > { %914 = shalt.err (!%p911_p1)
}
  0x3c   : > { %804 = dma.hbm_to_vmem [thread:$0]  (!%p1098_p11), %s1290_s2, 64, %s1102_s25, [#allocation6]  }
  0x3d   : > { %s1157_s4 = sadd.s32 1, %s1015_s15   ;;  %s27_s23 = sadd.s32 1, %s1011_s14 }
  0x3e   : > { %s24_s5 = ssub.s32 %s1015_s15, %s1157_s4  ;;  %p34_p13 = scmp.ne.s32.totalorder %s1011_s14, %s1007_s13 }
  0x3f   : > { %p25_p6 = scmp.eq.s32.totalorder %s24_s5, 0  ;;  %p35_p10 = scmp.eq.s32.totalorder %s1015_s15, 0 }
  0x40   : > { %p1299_p3 = scmp.eq.s32.totalorder %s1068_s16, 1  ;;  %p815_p7 = scmp.lt.s32.totalorder %s1015_s15, 2 }
  0x41   : > { %s1173_s7 = scalar_select %p25_p6, %s1011_s14, %s27_s23  }
  0x42   : > { %p1167_p5 = por %p1299_p3, %p34_p13  ;;  %p36_p9 = por %p35_p10, %p34_p13 }
  0x43   : > { %s156_s8 = sand.u32 1, %s1011_s14   ;;  %s656_s25 = sshll.u32 %s1015_s15, 9 }
  0x44   : > { %s1300_s6 = scalar_select %p1167_p5, 1, 0 }
  0x45   : > { %s643_s9 = sshll.u32 %s156_s8, 5  ;;  %s1180_s17 = scalar_lea.hbm %s1288_s0, %s656_s25 }
  0x46   : > { %s160_s21 = scalar_lea.vmem [#allocation2], %s643_s9  ;;  %p1184_p11 = pnand %p815_p7, %p36_p9 }
  0x47   : > { %s167_s24 = sshll.u32 %s160_s21, 4  ;;  %s1188_s27 = scalar_lea.sflag [#allocation3], %s156_s8  ;;  %s1182_s24 = int_to_ptr.vmem [resolvable:$true] %s167_s24 }
  0x48   : > { %s915_s28 = scalar_lea.hbm %s1180_s17, 512  ;;  %p917_p0 = pneg %p1184_p11 }
  0x49   : > { %p916_p12 = scmp.ne.s32.totalorder %s1180_s17, %s915_s28  ;;  %s920_s30 = scalar_lea.hbm %s1288_s0, 1024 }
  0x4a   : > { %p921_p13 = scmp.lt.u32.totalorder %s1180_s17, %s1288_s0  ;;  %p922_p6 = scmp.lt.u32.totalorder %s920_s30, %s915_s28 }
  0x4b   : > { %p918_p2 = pnand %p917_p0, %p916_p12  ;;  %p924_p3 = scmp.lt.u32.totalorder %s915_s28, %s1180_s17 }
  0x4c   : > { %p923_p10 = por %p922_p6, %p921_p13 }
  0x4d   : > { %p919_p1 = pneg %p918_p2 }
  0x4e   : > { %p925_p7 = por %p924_p3, %p923_p10 }
  0x50   : > { %p926_p9 = pnand %p925_p7, %p919_p1 }
  0x52   : > { %929 = shalt.err (!%p926_p9)
}
  0x53   : > { %s930_s8 = scalar_lea.vmem %s1182_s24, 512  ;;  %s1021_s9 = smov [#allocation2]  }
  0x54   : > { %p931_p12 = scmp.ne.s32.totalorder %s1182_s24, %s930_s8  ;;  %s935_s25 = sshll.u32 %s1021_s9, 4  ;;  %s936_s25 = int_to_ptr.vmem [resolvable:$false] %s935_s25 }
  0x55   : > { %s937_s10 = scalar_lea.vmem %s936_s25, 1024  ;;  %p938_p4 = scmp.lt.s32.totalorder %s1182_s24, %s936_s25 }
  0x56   : > { %p933_p2 = pnand %p931_p12, %p917_p0  ;;  %p939_p13 = scmp.lt.s32.totalorder %s937_s10, %s930_s8 }
  0x58   : > { %p934_p5 = pneg %p933_p2  ;;  %p940_p6 = por %p939_p13, %p938_p4 }
  0x5a   : > { %p941_p10 = pnand %p940_p6, %p934_p5 }
  0x5c   : > { %944 = shalt.err (!%p941_p10)
}
  0x5d   : > { %s1022_s11 = smov 256   ;;  %s1023_s21 = smov 16  }
  0x5e   : > { %808 = dma.hbm_to_vmem [thread:$0]  (!%p1184_p11), %s1180_s17, 512, %s1182_s24, %s1188_s27, %s1022_s11, %s1022_s11, %s1023_s21  }
  0x5f   : > { %179 = sbr.rel (%p1087_p8) target bundleno = 409 (0x199), region = 32  ;;  %s1219_s28 = sand.u32 (!%p1087_p8), 1, %s1007_s13  }
  0x60   : > { %s647_s22 = sshll.u32 (!%p1087_p8), %s1219_s28, 5  ;;  %s182_s29 = scalar_lea.sflag (!%p1087_p8), [#allocation3], %s1219_s28 }
  0x61   : > { %s1223_s30 = scalar_lea.vmem (!%p1087_p8), [#allocation2], %s647_s22  ;;  %p1302_p4 = scmp.ne.s32.totalorder (!%p1087_p8), %s1295_s18, 0 }
  0x66   : > { %990 = dma.done.wait (%p1302_p4), %s182_s29, 512  }
  0x67   : > { %992 = vsyncadd (%p1302_p4), %s182_s29, 4294966784  ;;  %p1303_p5 = scmp.eq.s32.totalorder %s1068_s16, 0 }
  0x69   : > { %994 = dma.done.wait (%p1303_p5), [#allocation6], 16448   ;;  %p1304_p8 = pmov %p1303_p5 }
  0x6a   : > { %v221_v0 = vld [vmem:[#allocation5 + $0x8] sm:$0xff]  ;;  %v223_v2 = vld [vmem:[#allocation5 + $0x18] sm:$0xff]  ;;  %v220_v5 = vld [vmem:[#allocation5] sm:$0xff]  ;;  %s650_s18 = sshll.u32 %s1219_s28, 6  ;;  %s657_s24 = sshll.u32 %s1068_s16, 10 }
  0x6b   : > { %996 = vsyncadd (%p1304_p8), [#allocation6], 4294950848  ;;  %v225_v1 = vld [vmem:[#allocation5 + $0x28] sm:$0xff]  ;;  %v227_v4 = vld [vmem:[#allocation5 + $0x38] sm:$0xff]  ;;  %s215_s20 = scalar_lea.vmem [#allocation8], %s650_s18  ;;  %s1244_s16 = scalar_lea.hbm %s1291_s3, %s657_s24 }
  0x6c   : > { %v658_v3 = vpack.c.bf16 %v225_v1, %v221_v0  ;;  %v224_v6 = vld [vmem:[#allocation5 + $0x20] sm:$0xff]  ;;  %v722_v7 = vpack.c.bf16 %v227_v4, %v223_v2  ;;  %v222_v9 = vld [vmem:[#allocation5 + $0x10] sm:$0xff]  ;;  %v229_v11 = vld [vmem:[#allocation5 + $0x48] sm:$0xff]  ;;  %s546_s17 = sshll.u32 %s215_s20, 4  ;;  %s533_s23 = scalar_lea.sflag [#allocation4], %s1219_s28  ;;  %s1239_s17 = int_to_ptr.vmem [resolvable:$true] %s546_s17 }
  0x6d   : > { %v660_v8 = vpack.c.bf16 %v224_v6, %v220_v5  ;;  %v226_v10 = vld [vmem:[#allocation5 + $0x30] sm:$0xff]  ;;  %v233_v13 = vld [vmem:[#allocation5 + $0x68] sm:$0xff]  ;;  %v231_v14 = vld [vmem:[#allocation5 + $0x58] sm:$0xff]  ;;  %s945_s5 = scalar_lea.vmem %s1239_s17, 1024  ;;  %p1305_p0 = scmp.ne.s32.totalorder %s1300_s6, 0 }
  0x6e   : > { %659 = vmatprep.subr.bf16.mxu0 %v658_v3  ;;  %v724_v12 = vpack.c.bf16 %v226_v10, %v222_v9  ;;  %v235_v15 = vld [vmem:[#allocation5 + $0x78] sm:$0xff]  ;;  %723 = vmatprep.subr.bf16.mxu1 %v722_v7  ;;  %v662_v16 = vpack.c.bf16 %v233_v13, %v229_v11  ;;  %v228_v18 = vld [vmem:[#allocation5 + $0x40] sm:$0xff]  ;;  %v230_v20 = vld [vmem:[#allocation5 + $0x50] sm:$0xff]  ;;  %p946_p11 = scmp.ne.s32.totalorder %s1239_s17, %s945_s5  ;;  %s1024_s8 = smov [#allocation8]  }
  0x6f   : > { %661 = vmatpush1.bf16.msra.mxu0 %v660_v8  ;;  %v726_v17 = vpack.c.bf16 %v235_v15, %v231_v14  ;;  %v232_v19 = vld [vmem:[#allocation5 + $0x60] sm:$0xff]  ;;  %v234_v22 = vld [vmem:[#allocation5 + $0x70] sm:$0xff]  ;;  %v237_v23 = vld [vmem:[#allocation5 + $0x88] sm:$0xff]  ;;  %s949_s9 = sshll.u32 %s1024_s8, 4  ;;  %s950_s9 = int_to_ptr.vmem [resolvable:$false] %s949_s9 }
  0x70   : > { %725 = vmatpush1.bf16.msra.mxu1 %v724_v12  ;;  %v664_v21 = vpack.c.bf16 %v232_v19, %v228_v18  ;;  %v241_v24 = vld [vmem:[#allocation5 + $0xa8] sm:$0xff]  ;;  %663 = vmatprep.subr.bf16.mxu0 %v662_v16  ;;  %v728_v25 = vpack.c.bf16 %v234_v22, %v230_v20  ;;  %v239_v27 = vld [vmem:[#allocation5 + $0x98] sm:$0xff]  ;;  %v236_v29 = vld [vmem:[#allocation5 + $0x80] sm:$0xff]  ;;  %p947_p1 = pnand %p946_p11, %p1305_p0  ;;  %s951_s25 = scalar_lea.vmem %s950_s9, 2048 }
  0x71   : > { %727 = vmatprep.subr.bf16.mxu1 %v726_v17  ;;  %v666_v26 = vpack.c.bf16 %v241_v24, %v237_v23  ;;  %v243_v28 = vld [vmem:[#allocation5 + $0xb8] sm:$0xff]  ;;  %v240_v31 = vld [vmem:[#allocation5 + $0xa0] sm:$0xff]  ;;  %v238_v32 = vld [vmem:[#allocation5 + $0x90] sm:$0xff]  ;;  %p952_p7 = scmp.lt.s32.totalorder %s1239_s17, %s950_s9  ;;  %p953_p9 = scmp.lt.s32.totalorder %s951_s25, %s945_s5 }
  0x72   : > { %v730_v30 = vpack.c.bf16 %v243_v28, %v239_v27  ;;  %v242_v33 = vld [vmem:[#allocation5 + $0xb0] sm:$0xff]  ;;  %v668_v34 = vpack.c.bf16 %v240_v31, %v236_v29  ;;  %v245_v35 = vld [vmem:[#allocation5 + $0xc8] sm:$0xff]  ;;  %v247_v37 = vld [vmem:[#allocation5 + $0xd8] sm:$0xff]  ;;  %p948_p3 = pneg %p947_p1 }
  0x73   : > { %665 = vmatpush1.bf16.msra.mxu0 %v664_v21  ;;  %v249_v36 = vld [vmem:[#allocation5 + $0xe8] sm:$0xff]  ;;  %v732_v38 = vpack.c.bf16 %v242_v33, %v238_v32  ;;  %v251_v40 = vld [vmem:[#allocation5 + $0xf8] sm:$0xff]  ;;  %v244_v41 = vld [vmem:[#allocation5 + $0xc0] sm:$0xff]  ;;  %p954_p12 = por %p953_p9, %p952_p7 }
  0x74   : > { %729 = vmatpush1.bf16.msra.mxu1 %v728_v25  ;;  %667 = vmatprep.subr.bf16.mxu0 %v666_v26  ;;  %v670_v39 = vpack.c.bf16 %v249_v36, %v245_v35  ;;  %v248_v42 = vld [vmem:[#allocation5 + $0xe0] sm:$0xff]  ;;  %v734_v43 = vpack.c.bf16 %v251_v40, %v247_v37  ;;  %v246_v44 = vld [vmem:[#allocation5 + $0xd0] sm:$0xff]  ;;  %v253_v46 = vld [vmem:[#allocation5 + $0x108] sm:$0xff] }
  0x75   : > { %731 = vmatprep.subr.bf16.mxu1 %v730_v30  ;;  %v250_v45 = vld [vmem:[#allocation5 + $0xf0] sm:$0xff]  ;;  %v257_v47 = vld [vmem:[#allocation5 + $0x128] sm:$0xff]  ;;  %v255_v48 = vld [vmem:[#allocation5 + $0x118] sm:$0xff]  ;;  %v672_v50 = vpack.c.bf16 %v248_v42, %v244_v41  ;;  %p955_p2 = pnand %p954_p12, %p948_p3 }
  0x76   : > { %v259_v49 = vld [vmem:[#allocation5 + $0x138] sm:$0xff]  ;;  %v736_v51 = vpack.c.bf16 %v250_v45, %v246_v44  ;;  %v674_v52 = vpack.c.bf16 %v257_v47, %v253_v46  ;;  %v252_v53 = vld [vmem:[#allocation5 + $0x100] sm:$0xff]  ;;  %v254_v55 = vld [vmem:[#allocation5 + $0x110] sm:$0xff] }
  0x77   : > { %669 = vmatpush1.bf16.msra.mxu0 %v668_v34  ;;  %v256_v54 = vld [vmem:[#allocation5 + $0x120] sm:$0xff]  ;;  %v738_v56 = vpack.c.bf16 %v259_v49, %v255_v48  ;;  %v258_v57 = vld [vmem:[#allocation5 + $0x130] sm:$0xff]  ;;  %v261_v58 = vld [vmem:[#allocation5 + $0x148] sm:$0xff] }
  0x78   : > { %733 = vmatpush1.bf16.msra.mxu1 %v732_v38  ;;  %671 = vmatprep.subr.bf16.mxu0 %v670_v39  ;;  %v265_v59 = vld [vmem:[#allocation5 + $0x168] sm:$0xff]  ;;  %v263_v60 = vld [vmem:[#allocation5 + $0x158] sm:$0xff]  ;;  %v676_v62 = vpack.c.bf16 %v256_v54, %v252_v53  ;;  %v740_v63 = vpack.c.bf16 %v258_v57, %v254_v55  ;;  %v260_v1 = vld [vmem:[#allocation5 + $0x140] sm:$0xff] }
  0x79   : > { %735 = vmatprep.subr.bf16.mxu1 %v734_v43  ;;  %v267_v61 = vld [vmem:[#allocation5 + $0x178] sm:$0xff]  ;;  %v678_v0 = vpack.c.bf16 %v265_v59, %v261_v58  ;;  %v264_v2 = vld [vmem:[#allocation5 + $0x160] sm:$0xff]  ;;  %v262_v3 = vld [vmem:[#allocation5 + $0x150] sm:$0xff] }
  0x7a   : > { %v742_v4 = vpack.c.bf16 %v267_v61, %v263_v60  ;;  %v266_v5 = vld [vmem:[#allocation5 + $0x170] sm:$0xff]  ;;  %v269_v6 = vld [vmem:[#allocation5 + $0x188] sm:$0xff]  ;;  %v271_v8 = vld [vmem:[#allocation5 + $0x198] sm:$0xff]  ;;  %v680_v10 = vpack.c.bf16 %v264_v2, %v260_v1 }
  0x7b   : > { %673 = vmatpush1.bf16.msra.mxu0 %v672_v50  ;;  %v273_v7 = vld [vmem:[#allocation5 + $0x1a8] sm:$0xff]  ;;  %v275_v9 = vld [vmem:[#allocation5 + $0x1b8] sm:$0xff]  ;;  %v744_v11 = vpack.c.bf16 %v266_v5, %v262_v3  ;;  %v268_v13 = vld [vmem:[#allocation5 + $0x180] sm:$0xff] }
  0x7c   : > { %737 = vmatpush1.bf16.msra.mxu1 %v736_v51  ;;  %675 = vmatprep.subr.bf16.mxu0 %v674_v52  ;;  %v682_v12 = vpack.c.bf16 %v273_v7, %v269_v6  ;;  %v272_v14 = vld [vmem:[#allocation5 + $0x1a0] sm:$0xff]  ;;  %v270_v15 = vld [vmem:[#allocation5 + $0x190] sm:$0xff]  ;;  %v746_v16 = vpack.c.bf16 %v275_v9, %v271_v8  ;;  %v277_v18 = vld [vmem:[#allocation5 + $0x1c8] sm:$0xff] }
  0x7d   : > { %739 = vmatprep.subr.bf16.mxu1 %v738_v56  ;;  %v274_v17 = vld [vmem:[#allocation5 + $0x1b0] sm:$0xff]  ;;  %v281_v19 = vld [vmem:[#allocation5 + $0x1e8] sm:$0xff]  ;;  %v279_v20 = vld [vmem:[#allocation5 + $0x1d8] sm:$0xff]  ;;  %v684_v22 = vpack.c.bf16 %v272_v14, %v268_v13 }
  0x7e   : > { %v283_v21 = vld [vmem:[#allocation5 + $0x1f8] sm:$0xff]  ;;  %v748_v23 = vpack.c.bf16 %v274_v17, %v270_v15  ;;  %v686_v24 = vpack.c.bf16 %v281_v19, %v277_v18  ;;  %v276_v25 = vld [vmem:[#allocation5 + $0x1c0] sm:$0xff]  ;;  %v278_v27 = vld [vmem:[#allocation5 + $0x1d0] sm:$0xff] }
  0x7f   : > { %677 = vmatpush1.bf16.msra.mxu0 %v676_v62  ;;  %v280_v26 = vld [vmem:[#allocation5 + $0x1e0] sm:$0xff]  ;;  %v750_v28 = vpack.c.bf16 %v283_v21, %v279_v20  ;;  %v282_v29 = vld [vmem:[#allocation5 + $0x1f0] sm:$0xff]  ;;  %v285_v30 = vld [vmem:[#allocation5 + $0x208] sm:$0xff] }
  0x80   : > { %741 = vmatpush1.bf16.msra.mxu1 %v740_v63  ;;  %679 = vmatprep.subr.bf16.mxu0 %v678_v0  ;;  %v289_v31 = vld [vmem:[#allocation5 + $0x228] sm:$0xff]  ;;  %v287_v32 = vld [vmem:[#allocation5 + $0x218] sm:$0xff]  ;;  %v688_v34 = vpack.c.bf16 %v280_v26, %v276_v25  ;;  %v752_v35 = vpack.c.bf16 %v282_v29, %v278_v27  ;;  %v284_v37 = vld [vmem:[#allocation5 + $0x200] sm:$0xff] }
  0x81   : > { %743 = vmatprep.subr.bf16.mxu1 %v742_v4  ;;  %v291_v33 = vld [vmem:[#allocation5 + $0x238] sm:$0xff]  ;;  %v690_v36 = vpack.c.bf16 %v289_v31, %v285_v30  ;;  %v288_v38 = vld [vmem:[#allocation5 + $0x220] sm:$0xff]  ;;  %v286_v39 = vld [vmem:[#allocation5 + $0x210] sm:$0xff] }
  0x82   : > { %v754_v40 = vpack.c.bf16 %v291_v33, %v287_v32  ;;  %v290_v41 = vld [vmem:[#allocation5 + $0x230] sm:$0xff]  ;;  %v293_v42 = vld [vmem:[#allocation5 + $0x248] sm:$0xff]  ;;  %v295_v44 = vld [vmem:[#allocation5 + $0x258] sm:$0xff]  ;;  %v692_v46 = vpack.c.bf16 %v288_v38, %v284_v37 }
  0x83   : > { %681 = vmatpush1.bf16.msra.mxu0 %v680_v10  ;;  %v297_v43 = vld [vmem:[#allocation5 + $0x268] sm:$0xff]  ;;  %v299_v45 = vld [vmem:[#allocation5 + $0x278] sm:$0xff]  ;;  %v756_v47 = vpack.c.bf16 %v290_v41, %v286_v39  ;;  %v292_v49 = vld [vmem:[#allocation5 + $0x240] sm:$0xff] }
  0x84   : > { %745 = vmatpush1.bf16.msra.mxu1 %v744_v11  ;;  %683 = vmatprep.subr.bf16.mxu0 %v682_v12  ;;  %v694_v48 = vpack.c.bf16 %v297_v43, %v293_v42  ;;  %v296_v50 = vld [vmem:[#allocation5 + $0x260] sm:$0xff]  ;;  %v294_v51 = vld [vmem:[#allocation5 + $0x250] sm:$0xff]  ;;  %v758_v52 = vpack.c.bf16 %v299_v45, %v295_v44  ;;  %v301_v54 = vld [vmem:[#allocation5 + $0x288] sm:$0xff] }
  0x85   : > { %747 = vmatprep.subr.bf16.mxu1 %v746_v16  ;;  %v298_v53 = vld [vmem:[#allocation5 + $0x270] sm:$0xff]  ;;  %v305_v55 = vld [vmem:[#allocation5 + $0x2a8] sm:$0xff]  ;;  %v303_v56 = vld [vmem:[#allocation5 + $0x298] sm:$0xff]  ;;  %v696_v58 = vpack.c.bf16 %v296_v50, %v292_v49 }
  0x86   : > { %v307_v57 = vld [vmem:[#allocation5 + $0x2b8] sm:$0xff]  ;;  %v760_v59 = vpack.c.bf16 %v298_v53, %v294_v51  ;;  %v698_v60 = vpack.c.bf16 %v305_v55, %v301_v54  ;;  %v300_v61 = vld [vmem:[#allocation5 + $0x280] sm:$0xff]  ;;  %v302_v63 = vld [vmem:[#allocation5 + $0x290] sm:$0xff] }
  0x87   : > { %685 = vmatpush1.bf16.msra.mxu0 %v684_v22  ;;  %v304_v62 = vld [vmem:[#allocation5 + $0x2a0] sm:$0xff]  ;;  %v762_v0 = vpack.c.bf16 %v307_v57, %v303_v56  ;;  %v306_v1 = vld [vmem:[#allocation5 + $0x2b0] sm:$0xff]  ;;  %v309_v2 = vld [vmem:[#allocation5 + $0x2c8] sm:$0xff] }
  0x88   : > { %749 = vmatpush1.bf16.msra.mxu1 %v748_v23  ;;  %687 = vmatprep.subr.bf16.mxu0 %v686_v24  ;;  %v313_v3 = vld [vmem:[#allocation5 + $0x2e8] sm:$0xff]  ;;  %v311_v4 = vld [vmem:[#allocation5 + $0x2d8] sm:$0xff]  ;;  %v700_v6 = vpack.c.bf16 %v304_v62, %v300_v61  ;;  %v308_v7 = vld [vmem:[#allocation5 + $0x2c0] sm:$0xff]  ;;  %v764_v8 = vpack.c.bf16 %v306_v1, %v302_v63 }
  0x89   : > { %751 = vmatprep.subr.bf16.mxu1 %v750_v28  ;;  %v315_v5 = vld [vmem:[#allocation5 + $0x2f8] sm:$0xff]  ;;  %v702_v9 = vpack.c.bf16 %v313_v3, %v309_v2  ;;  %v312_v10 = vld [vmem:[#allocation5 + $0x2e0] sm:$0xff]  ;;  %v310_v11 = vld [vmem:[#allocation5 + $0x2d0] sm:$0xff] }
  0x8a   : > { %v314_v12 = vld [vmem:[#allocation5 + $0x2f0] sm:$0xff]  ;;  %v766_v13 = vpack.c.bf16 %v315_v5, %v311_v4  ;;  %v317_v14 = vld [vmem:[#allocation5 + $0x308] sm:$0xff]  ;;  %v319_v17 = vld [vmem:[#allocation5 + $0x318] sm:$0xff]  ;;  %v704_v19 = vpack.c.bf16 %v312_v10, %v308_v7  ;;  %v350_v4 = vlaneseq }
  0x8b   : > { %689 = vmatpush1.bf16.msra.mxu0 %v688_v34  ;;  %v321_v15 = vld [vmem:[#allocation5 + $0x328] sm:$0xff]  ;;  %v323_v18 = vld [vmem:[#allocation5 + $0x338] sm:$0xff]  ;;  %v768_v20 = vpack.c.bf16 %v314_v12, %v310_v11  ;;  %v316_v22 = vld [vmem:[#allocation5 + $0x300] sm:$0xff] }
  0x8c   : > { %753 = vmatpush1.bf16.msra.mxu1 %v752_v35  ;;  %691 = vmatprep.subr.bf16.mxu0 %v690_v36  ;;  %v217_v16 = vld [vmem:[%s1223_s30 + $0x8] sm:$0xff]  ;;  %v706_v21 = vpack.c.bf16 %v321_v15, %v317_v14  ;;  %v320_v23 = vld [vmem:[#allocation5 + $0x320] sm:$0xff]  ;;  %v318_v24 = vld [vmem:[#allocation5 + $0x310] sm:$0xff]  ;;  %v770_v25 = vpack.c.bf16 %v323_v18, %v319_v17  ;;  %v351_v5 = vshrl.u32 %v350_v4, 7 }
  0x8d   : > { %755 = vmatprep.subr.bf16.mxu1 %v754_v40  ;;  %434 = vmatprep.mubr.f32.mxu0 %v217_v16  ;;  %v322_v26 = vld [vmem:[#allocation5 + $0x330] sm:$0xff]  ;;  %v325_v27 = vld [vmem:[#allocation5 + $0x348] sm:$0xff]  ;;  %v327_v29 = vld [vmem:[#allocation5 + $0x358] sm:$0xff]  ;;  %v708_v31 = vpack.c.bf16 %v320_v23, %v316_v22 }
  0x8e   : > { %511 = vmatprep.mubr.f32.mxu1 %v217_v16  ;;  %v329_v28 = vld [vmem:[#allocation5 + $0x368] sm:$0xff]  ;;  %v331_v30 = vld [vmem:[#allocation5 + $0x378] sm:$0xff]  ;;  %v772_v32 = vpack.c.bf16 %v322_v26, %v318_v24  ;;  %v324_v34 = vld [vmem:[#allocation5 + $0x340] sm:$0xff]  ;;  %v364_v10 = vsub.s32 3, %v351_v5 }
  0x8f   : > { %693 = vmatpush1.bf16.msra.mxu0 %v692_v46  ;;  %v710_v33 = vpack.c.bf16 %v329_v28, %v325_v27  ;;  %v328_v35 = vld [vmem:[#allocation5 + $0x360] sm:$0xff]  ;;  %v326_v36 = vld [vmem:[#allocation5 + $0x350] sm:$0xff]  ;;  %v774_v37 = vpack.c.bf16 %v331_v30, %v327_v29  ;;  %v333_v39 = vld [vmem:[#allocation5 + $0x388] sm:$0xff] }
  0x90   : > { %757 = vmatpush1.bf16.msra.mxu1 %v756_v47  ;;  %695 = vmatprep.subr.bf16.mxu0 %v694_v48  ;;  %v330_v38 = vld [vmem:[#allocation5 + $0x370] sm:$0xff]  ;;  %v337_v40 = vld [vmem:[#allocation5 + $0x3a8] sm:$0xff]  ;;  %v335_v41 = vld [vmem:[#allocation5 + $0x398] sm:$0xff]  ;;  %v712_v43 = vpack.c.bf16 %v328_v35, %v324_v34 }
  0x91   : > { %759 = vmatprep.subr.bf16.mxu1 %v758_v52  ;;  %v339_v42 = vld [vmem:[#allocation5 + $0x3b8] sm:$0xff]  ;;  %v776_v44 = vpack.c.bf16 %v330_v38, %v326_v36  ;;  %v714_v45 = vpack.c.bf16 %v337_v40, %v333_v39  ;;  %v332_v46 = vld [vmem:[#allocation5 + $0x380] sm:$0xff]  ;;  %v334_v48 = vld [vmem:[#allocation5 + $0x390] sm:$0xff] }
  0x92   : > { %v336_v47 = vld [vmem:[#allocation5 + $0x3a0] sm:$0xff]  ;;  %v778_v49 = vpack.c.bf16 %v339_v42, %v335_v41  ;;  %v338_v50 = vld [vmem:[#allocation5 + $0x3b0] sm:$0xff]  ;;  %v341_v51 = vld [vmem:[#allocation5 + $0x3c8] sm:$0xff] }
  0x93   : > { %697 = vmatpush1.bf16.msra.mxu0 %v696_v58  ;;  %v345_v52 = vld [vmem:[#allocation5 + $0x3e8] sm:$0xff]  ;;  %v343_v53 = vld [vmem:[#allocation5 + $0x3d8] sm:$0xff]  ;;  %v716_v55 = vpack.c.bf16 %v336_v47, %v332_v46  ;;  %v780_v56 = vpack.c.bf16 %v338_v50, %v334_v48  ;;  %v340_v58 = vld [vmem:[#allocation5 + $0x3c0] sm:$0xff] }
  0x94   : > { %761 = vmatpush1.bf16.msra.mxu1 %v760_v59  ;;  %699 = vmatprep.subr.bf16.mxu0 %v698_v60  ;;  %v347_v54 = vld [vmem:[#allocation5 + $0x3f8] sm:$0xff]  ;;  %v718_v57 = vpack.c.bf16 %v345_v52, %v341_v51  ;;  %v344_v59 = vld [vmem:[#allocation5 + $0x3e0] sm:$0xff]  ;;  %v342_v61 = vld [vmem:[#allocation5 + $0x3d0] sm:$0xff] }
  0x95   : > { %763 = vmatprep.subr.bf16.mxu1 %v762_v0  ;;  %v782_v60 = vpack.c.bf16 %v347_v54, %v343_v53  ;;  %v346_v62 = vld [vmem:[#allocation5 + $0x3f0] sm:$0xff]  ;;  %v720_v63 = vpack.c.bf16 %v344_v59, %v340_v58  ;;  %v216_v1 = vld [vmem:[%s1223_s30] sm:$0xff]  ;;  %v219_v2 = vld [vmem:[%s1223_s30 + $0x18] sm:$0xff] }
  0x96   : > { %v784_v0 = vpack.c.bf16 %v346_v62, %v342_v61  ;;  %v218_v3 = vld [vmem:[%s1223_s30 + $0x10] sm:$0xff]  ;;  %v348_v7 = vld [vmem:[#allocation7] sm:$0xf] }
  0x97   : > { %701 = vmatpush1.bf16.msra.mxu0 %v700_v6  ;;  %v352_v6 = vsub.s32 0, %v351_v5  ;;  %v365_v14 = vrot.slane %v348_v7, %v364_v10 }
  0x98   : > { %765 = vmatpush1.bf16.msra.mxu1 %v764_v8  ;;  %703 = vmatprep.subr.bf16.mxu0 %v702_v9  ;;  %v360_v8 = vsub.s32 2, %v351_v5  ;;  %v356_v9 = vsub.s32 1, %v351_v5 }
  0x99   : > { %767 = vmatprep.subr.bf16.mxu1 %v766_v13  ;;  %v353_v11 = vrot.slane %v348_v7, %v352_v6 }
  0x9a   : > { %v361_v12 = vrot.slane %v348_v7, %v360_v8  ;;  %v357_v13 = vrot.slane %v348_v7, %v356_v9 }
  0x9b   : > { %705 = vmatpush1.bf16.msra.mxu0 %v704_v19 }
  0x9c   : > { %769 = vmatpush1.bf16.msra.mxu1 %v768_v20  ;;  %707 = vmatprep.subr.bf16.mxu0 %v706_v21 }
  0x9d   : > { %771 = vmatprep.subr.bf16.mxu1 %v770_v25 }
  0x9f   : > { %709 = vmatpush1.bf16.msra.mxu0 %v708_v31 }
  0xa0   : > { %773 = vmatpush1.bf16.msra.mxu1 %v772_v32  ;;  %711 = vmatprep.subr.bf16.mxu0 %v710_v33 }
  0xa1   : > { %775 = vmatprep.subr.bf16.mxu1 %v774_v37 }
  0xa3   : > { %713 = vmatpush1.bf16.msra.mxu0 %v712_v43 }
  0xa4   : > { %777 = vmatpush1.bf16.msra.mxu1 %v776_v44  ;;  %715 = vmatprep.subr.bf16.mxu0 %v714_v45 }
  0xa5   : > { %779 = vmatprep.subr.bf16.mxu1 %v778_v49 }
  0xa7   : > { %717 = vmatpush1.bf16.msra.mxu0 %v716_v55 }
  0xa8   : > { %781 = vmatpush1.bf16.msra.mxu1 %v780_v56  ;;  %719 = vmatprep.subr.bf16.mxu0 %v718_v57 }
  0xa9   : > { %783 = vmatprep.subr.bf16.mxu1 %v782_v60 }
  0xab   : > { %721 = vmatpush1.bf16.msra.mxu0 %v720_v63 }
  0xac   : > { %785 = vmatpush1.bf16.msra.mxu1 %v784_v0 }
  0xae   : > { %435 = vmatmul.mubr.f32.vlgmr.msra.gmra.mrb[0].mxu0 %v216_v1 }
  0xaf   : > { %512 = vmatmul.mubr.f32.vlgmr.msra.gmra.mrb[0].mxu1 %v216_v1  ;;  %440 = vmatprep.mubr.f32.mxu0 %v219_v2 }
  0xb0   : > { %517 = vmatprep.mubr.f32.mxu1 %v219_v2 }
  0xb2   : > { %441 = vmatmul.mubr.f32.gmra.mrb[2].mxu0 %v218_v3 }
  0xb3   : > { %518 = vmatmul.mubr.f32.gmra.mrb[2].mxu1 %v218_v3 }
 0x181   : > { %v436_v15 = vpop.f32.mrb[0].mxu0 }
 0x182   : > { %v437_v16 = vadd.f32 %v436_v15, %v353_v11  ;;  %v513_v17 = vpop.f32.mrb[0].mxu1  ;;  %v438_v18 = vpop.f32.mrb[1].mxu0 }
 0x183   : > { %v514_v19 = vadd.f32 %v513_v17, %v361_v12  ;;  %v439_v20 = vadd.f32 %v438_v18, %v357_v13  ;;  %v515_v21 = vpop.f32.mrb[1].mxu1 }
 0x184   : > { %524 = vst [vmem:[%s215_s20] sm:$0xff] %v437_v16  ;;  %v516_v22 = vadd.f32 %v515_v21, %v365_v14 }
 0x185   : > { %526 = vst [vmem:[%s215_s20 + $0x10] sm:$0xff] %v514_v19  ;;  %525 = vst [vmem:[%s215_s20 + $0x8] sm:$0xff] %v439_v20  ;;  %v442_v23 = vpop.f32.mrb[2].mxu0 }
 0x186   : > { %527 = vst [vmem:[%s215_s20 + $0x18] sm:$0xff] %v516_v22  ;;  %v443_v24 = vadd.f32 %v442_v23, %v353_v11  ;;  %v519_v25 = vpop.f32.mrb[2].mxu1  ;;  %v444_v26 = vpop.f32.mrb[3].mxu0 }
 0x187   : > { %v520_v27 = vadd.f32 %v519_v25, %v361_v12  ;;  %v445_v28 = vadd.f32 %v444_v26, %v357_v13  ;;  %v521_v29 = vpop.f32.mrb[3].mxu1 }
 0x188   : > { %528 = vst [vmem:[%s215_s20 + $0x20] sm:$0xff] %v443_v24  ;;  %v522_v30 = vadd.f32 %v521_v29, %v365_v14 }
 0x189   : > { %530 = vst [vmem:[%s215_s20 + $0x30] sm:$0xff] %v520_v27  ;;  %529 = vst [vmem:[%s215_s20 + $0x28] sm:$0xff] %v445_v28 }
 0x18a   : > { %531 = vst [vmem:[%s215_s20 + $0x38] sm:$0xff] %v522_v30 }
 0x18b   : > { %958 = shalt.err (!%p955_p2)
}
 0x18c   : > { %s959_s10 = scalar_lea.hbm %s1244_s16, 1024  ;;  %s963_s22 = scalar_lea.hbm %s1291_s3, 2048 }
 0x18d   : > { %p960_p13 = scmp.ne.s32.totalorder %s1244_s16, %s959_s10  ;;  %p964_p4 = scmp.lt.u32.totalorder %s1244_s16, %s1291_s3 }
 0x18e   : > { %p965_p5 = scmp.lt.u32.totalorder %s963_s22, %s959_s10  ;;  %p967_p11 = scmp.lt.u32.totalorder %s959_s10, %s1244_s16 }
 0x18f   : > { %p961_p6 = pnand %p960_p13, %p1305_p0 }
 0x190   : > { %p966_p8 = por %p965_p5, %p964_p4 }
 0x191   : > { %p962_p10 = pneg %p961_p6 }
 0x192   : > { %p968_p1 = por %p967_p11, %p966_p8 }
 0x194   : > { %p969_p3 = pnand %p968_p1, %p962_p10 }
 0x196   : > { %972 = shalt.err (!%p969_p3)
}
 0x197   : > { %s1025_s18 = smov 512   ;;  %s1026_s20 = smov 32  }
 0x198   : > { %796 = dma.vmem_to_hbm [thread:$0]  (%p1305_p0), %s1239_s17, 1024, %s1244_s16, %s533_s23, %s1025_s18, %s1025_s18, %s1026_s20  }
 0x199 PF: > { %s561_s24 = sand.u32 1, %s1003_s12   ;;  %p1306_p7 = scmp.ne.s32.totalorder %s1296_s19, 0 }
 0x19a   : > { %p1307_p9 = scmp.ge.s32.totalorder %s1015_s15, 2  ;;  %s562_s26 = scalar_lea.sflag [#allocation4], %s561_s24 }
 0x19c   : > { %p810_p12 = pnand %p1307_p9, %p1306_p7 }
 0x19e   : > { %998 = dma.done.wait (!%p810_p12), %s562_s26, 1024  }
 0x19f   : > { %1000 = vsyncadd (!%p810_p12), %s562_s26, 4294966272  ;;  %p17_p2 = scmp.ge.s32.totalorder %s1157_s4, 4   ;;  %s1308_s12 = smov %s1007_s13 }
 0x1a0   : > { %s1309_s13 = smov %s1011_s14  ;;  %s1310_s14 = smov %s1173_s7 }
 0x1a1   : > { %s1311_s15 = smov %s1157_s4  ;;  %19 = sbr.rel (!%p17_p2) target bundleno = 6 (0x6), region = 85 }
 0x1a8   :  { %567 = vsyncpa [#allocation3], 1 }
 0x1a9   :  { %569 = vsyncpa [#allocation3 + $0x1], 1 }
 0x1aa   :  { %570 = vsyncpa [#allocation6], 1 }
 0x1ab   :  { %571 = vsyncpa [#allocation4], 1 }
 0x1ac   :  { %573 = vsyncpa [#allocation4 + $0x1], 1 }

</bundles_post_ra>
